<compile_context>
chip_gen: v7x
topology: tpu7x:2x2x1
jax: 0.10.0
libtpu: 0.0.40
codegen_flags: <defaults>
</compile_context>

<pallas_src>
import jax
import jax.numpy as jnp
import numpy as np
from jax.experimental import pallas as pl
from jax.experimental.pallas import tpu as pltpu


# ----------------------------------------------------------------------------- kernels
def _softmax_pool_fc(scores, vals, bias, expand, pool, wfc, bfc, out_ref):
    """Shared epilogue.

    scores: [TB*L, H] f32, vals: [TB*L, HD] f32, bias: [TB, L, H] f32
    (bias already contains the w_ks bias bk; bv is folded into bfc).
    """
    TB, L, H = bias.shape
    HD = vals.shape[-1]

    # Softmax over the sequence axis, kept in f32. The L-reductions here are
    # only H lanes wide, so the XLU passes are cheap.
    s = scores.reshape(TB, L, H) + bias
    m = jnp.max(s, axis=1, keepdims=True)                       # [TB, 1, H]
    p = jnp.exp(s - m)                                          # EUP
    den = jnp.sum(p, axis=1, keepdims=True)                     # [TB, 1, H]
    inv = pl.reciprocal(den, approx=True)                       # EUP slot
    inv = inv * (2.0 - den * inv)                               # 1 Newton step -> ~f32 exact
    attn = (p * inv).reshape(TB * L, H)                         # f32 weights

    # Head-expand (H -> HD one-hot) and pool over L on the MXU instead of XLU:
    #   pooled[b, h*dv + j] = sum_l attn[b, l, h] * vals[b, l, h*dv + j]
    attn_full = jnp.dot(attn, expand, preferred_element_type=jnp.float32)   # [TB*L, HD]
    pooled = jnp.dot(pool, attn_full * vals,
                     preferred_element_type=jnp.float32)                    # [TB, HD]

    out = jnp.dot(pooled.astype(wfc.dtype), wfc,
                  preferred_element_type=jnp.float32) + bfc                 # [TB, D]
    out_ref[...] = out.astype(out_ref.dtype)


def _mhp_kernel(k_ref, v_ref, bias_ref, wk_ref, wv_ref, expand_ref, pool_ref,
                wfc_ref, bfc_ref, out_ref):
    # k_ref / v_ref blocks are already flattened to [TB*L, D] wrapper-side.
    scores = jnp.dot(k_ref[...], wk_ref[...], preferred_element_type=jnp.float32)
    vals = jnp.dot(v_ref[...], wv_ref[...], preferred_element_type=jnp.float32)
    _softmax_pool_fc(scores, vals, bias_ref[...], expand_ref[...], pool_ref[...],
                     wfc_ref[...], bfc_ref[...], out_ref)


def _mhp_kernel_fused(x_ref, bias_ref, wkv_ref, expand_ref, pool_ref,
                      wfc_ref, bfc_ref, out_ref):
    # k and v are the same tensor: single streamed input, one [D, HD+H] matmul.
    HD = expand_ref.shape[1]
    kv = jnp.dot(x_ref[...], wkv_ref[...], preferred_element_type=jnp.float32)
    _softmax_pool_fc(kv[:, HD:], kv[:, :HD], bias_ref[...], expand_ref[...],
                     pool_ref[...], wfc_ref[...], bfc_ref[...], out_ref)


# ----------------------------------------------------------------------------- wrapper
def multi_head_pooling(k, v, bias, params, *, n_heads, d_v, block_b=None,
                       compute_dtype=jnp.bfloat16, shared_kv=None):
    """k, v: [B, L, D]; bias: [B, H, L]; returns [B, D] (float32)."""
    B, L, D = k.shape
    H, DV = n_heads, d_v
    HD = H * DV
    assert HD == D, "fc expects n_heads * d_v == d_model"
    if shared_kv is None:
        shared_kv = k is v

    # Batch tile: multiple of 8 so the (TB, D) output block is sublane-aligned,
    # small enough to keep >= 2 grid steps (v7x has 2 TensorCores) and to keep
    # the double-buffered streamed blocks inside v7x's 64 MiB VMEM.
    if block_b is None:
        if B > 8 and B % 8 == 0:
            block_b = 8
            while (block_b * 2 <= 32 and B % (block_b * 2) == 0
                   and B // (block_b * 2) >= 2):
                block_b *= 2
        else:
            block_b = B
    TB = block_b
    assert B % TB == 0 and (TB == B or TB % 8 == 0)
    grid = (B // TB,)

    f32 = jnp.float32
    cdt = compute_dtype
    wk, bk = params["wk"], params["bk"]
    wv, bv = params["wv"], params["bv"]
    wfc, bfc = params["wfc"], params["bfc"]

    # Wrapper-side constant folding (computed once, tiny):
    #   scores = k@wk + bk + bias              -> bias_eff = bias^T + bk
    #   sum_L attn == 1  =>  pool(vals + bv) = pool(vals) + bv, hence
    #   (pooled + bv)@wfc + bfc                -> bfc_eff = bv@wfc + bfc
    bias_eff = jnp.transpose(bias, (0, 2, 1)).astype(f32) + bk.astype(f32)   # [B, L, H]
    bfc_eff = bv.astype(f32) @ wfc.astype(f32) + bfc.astype(f32)             # [1, D]

    # 0/1 constant matrices: head expansion (H -> HD) and batch-pooling over L.
    # Kept f32 (attn stays f32; these are tiny VMEM residents).
    expand = jnp.repeat(jnp.eye(H, dtype=f32), DV, axis=1)                   # [H, HD]
    pool = (jnp.arange(TB)[:, None]
            == (jnp.arange(TB * L)[None, :] // L)).astype(f32)               # [TB, TB*L]

    # Flatten batch*seq wrapper-side (free, contiguous) -> lane-dense 2-D blocks.
    k2 = k.reshape(B * L, D).astype(cdt)

    const = lambda r, c: pl.BlockSpec((r, c), lambda b: (0, 0))
    stream = pl.BlockSpec((TB * L, D), lambda b: (b, 0))
    bias_spec = pl.BlockSpec((TB, L, H), lambda b: (b, 0, 0))
    out_spec = pl.BlockSpec((TB, D), lambda b: (b, 0))

    cparams = pltpu.CompilerParams(
        dimension_semantics=("parallel",),
        vmem_limit_bytes=48 * 1024 * 1024,   # explicit, with headroom under v7x's 64 MiB
    )
    out_shape = jax.ShapeDtypeStruct((B, D), f32)

    if shared_kv:
        wkv = jnp.concatenate([wv, wk], axis=1).astype(cdt)                  # [D, HD+H]
        return pl.pallas_call(
            _mhp_kernel_fused,
            out_shape=out_shape,
            grid=grid,
            in_specs=[stream, bias_spec, const(D, HD + H), const(H, HD),
                      const(TB, TB * L), const(D, D), const(1, D)],
            out_specs=out_spec,
            compiler_params=cparams,
        )(k2, bias_eff, wkv, expand, pool, wfc.astype(cdt), bfc_eff)

    v2 = v.reshape(B * L, D).astype(cdt)
    return pl.pallas_call(
        _mhp_kernel,
        out_shape=out_shape,
        grid=grid,
        in_specs=[stream, stream, bias_spec, const(D, H), const(D, HD),
                  const(H, HD), const(TB, TB * L), const(D, D), const(1, D)],
        out_specs=out_spec,
        compiler_params=cparams,
    )(k2, v2, bias_eff, wk.astype(cdt), wv.astype(cdt), expand, pool,
      wfc.astype(cdt), bfc_eff)


# ----------------------------------------------------------------------------- reference
def multi_head_pooling_ref(k, v, bias, params, *, n_heads, d_v,
                           compute_dtype=jnp.float32):
    """Pure-JAX reference mirroring the PyTorch forward.

    compute_dtype rounds the matmul inputs (bf16 on the MXU) while accumulating
    in f32, matching the kernel's precision regime.
    """
    rd = lambda x: x.astype(compute_dtype).astype(jnp.float32)
    B, L, D = k.shape
    H = n_heads
    scores = rd(k) @ rd(params["wk"]) + params["bk"]            # [B, L, H]
    scores = scores + jnp.transpose(bias, (0, 2, 1))
    attn = jax.nn.softmax(scores, axis=1)                       # softmax over L
    vals = (rd(v) @ rd(params["wv"]) + params["bv"]).reshape(B, L, H, d_v)
    pooled = jnp.einsum("blh,blhd->bhd", attn, vals).reshape(B, H * d_v)
    return rd(pooled) @ rd(params["wfc"]) + params["bfc"]


def init_params(key, d_model, n_heads, d_v):
    ks = jax.random.split(key, 6)
    scale = 0.1
    return {
        "wk": scale * jax.random.normal(ks[0], (d_model, n_heads), jnp.float32),
        "bk": scale * jax.random.normal(ks[1], (1, n_heads), jnp.float32),
        "wv": scale * jax.random.normal(ks[2], (d_model, n_heads * d_v), jnp.float32),
        "bv": scale * jax.random.normal(ks[3], (1, n_heads * d_v), jnp.float32),
        "wfc": scale * jax.random.normal(ks[4], (d_model, d_model), jnp.float32),
        "bfc": scale * jax.random.normal(ks[5], (1, d_model), jnp.float32),
    }


if __name__ == "__main__":
    B, L, D = 16, 8, 32        # small shapes; real d_model would be a mult. of 128
    H, DV = 4, 8               # n_heads * d_v == d_model

    key = jax.random.PRNGKey(0)
    kk, kv_, kb, kp = jax.random.split(key, 4)
    k_in = jax.random.normal(kk, (B, L, D), jnp.float32)
    v_in = jax.random.normal(kv_, (B, L, D), jnp.float32)
    bias = 0.5 * jax.random.normal(kb, (B, H, L), jnp.float32)
    params = init_params(kp, D, H, DV)

    # Path 1: distinct k/v, bf16 streaming (v6e/v7x default).
    out = multi_head_pooling(k_in, v_in, bias, params, n_heads=H, d_v=DV)
    out = jax.block_until_ready(out)
    ref_bf16 = multi_head_pooling_ref(k_in, v_in, bias, params, n_heads=H, d_v=DV,
                                      compute_dtype=jnp.bfloat16)
    np.testing.assert_allclose(np.asarray(out), np.asarray(ref_bf16),
                               rtol=1e-2, atol=1e-2)
    ref_f32 = multi_head_pooling_ref(k_in, v_in, bias, params, n_heads=H, d_v=DV)
    np.testing.assert_allclose(np.asarray(out), np.asarray(ref_f32),
                               rtol=3e-2, atol=3e-2)

    # Path 2: shared k == v -> fused single-stream kernel (half the HBM traffic).
    out_sh = multi_head_pooling(k_in, k_in, bias, params, n_heads=H, d_v=DV,
                                shared_kv=True)
    out_sh = jax.block_until_ready(out_sh)
    ref_sh = multi_head_pooling_ref(k_in, k_in, bias, params, n_heads=H, d_v=DV,
                                    compute_dtype=jnp.bfloat16)
    np.testing.assert_allclose(np.asarray(out_sh), np.asarray(ref_sh),
                               rtol=1e-2, atol=1e-2)

    # Path 3: full-f32 compute (v5e-style tuning) -> tight check vs exact ref.
    out_f32 = multi_head_pooling(k_in, v_in, bias, params, n_heads=H, d_v=DV,
                                 compute_dtype=jnp.float32)
    out_f32 = jax.block_until_ready(out_f32)
    np.testing.assert_allclose(np.asarray(out_f32), np.asarray(ref_f32),
                               rtol=1e-3, atol=1e-3)

    print("KERNEL_OK")
</pallas_src>

<mosaic_0001>
module attributes {stable_mosaic.version = 11 : i64} {
  func.func @_mhp_kernel(%arg0: i32, %arg1: memref<64x32xbf16, #tpu.memory_space<vmem>>, %arg2: memref<64x32xbf16, #tpu.memory_space<vmem>>, %arg3: memref<8x8x4xf32, #tpu.memory_space<vmem>>, %arg4: memref<32x4xbf16, #tpu.memory_space<vmem>>, %arg5: memref<32x32xbf16, #tpu.memory_space<vmem>>, %arg6: memref<4x32xf32, #tpu.memory_space<vmem>>, %arg7: memref<8x64xf32, #tpu.memory_space<vmem>>, %arg8: memref<32x32xbf16, #tpu.memory_space<vmem>>, %arg9: memref<1x32xf32, #tpu.memory_space<vmem>>, %arg10: memref<8x32xf32, #tpu.memory_space<vmem>>) attributes {dimension_semantics = [#tpu.dimension_semantics<parallel>], iteration_bounds = array<i64: 2>, scalar_prefetch = 0 : i64, scratch_operands = 0 : i64, tpu.core_type = #tpu.core_type<tc>, window_params = [{transform_indices = @transform_0, window_bounds = array<i64: 64, 32>}, {transform_indices = @transform_1, window_bounds = array<i64: 64, 32>}, {transform_indices = @transform_2, window_bounds = array<i64: 8, 8, 4>}, {pipeline_mode = #tpu.pipeline_mode<synchronous>, transform_indices = @transform_3, window_bounds = array<i64: 32, 4>}, {pipeline_mode = #tpu.pipeline_mode<synchronous>, transform_indices = @transform_4, window_bounds = array<i64: 32, 32>}, {pipeline_mode = #tpu.pipeline_mode<synchronous>, transform_indices = @transform_5, window_bounds = array<i64: 4, 32>}, {pipeline_mode = #tpu.pipeline_mode<synchronous>, transform_indices = @transform_6, window_bounds = array<i64: 8, 64>}, {pipeline_mode = #tpu.pipeline_mode<synchronous>, transform_indices = @transform_7, window_bounds = array<i64: 32, 32>}, {pipeline_mode = #tpu.pipeline_mode<synchronous>, transform_indices = @transform_8, window_bounds = array<i64: 1, 32>}, {transform_indices = @transform_9, window_bounds = array<i64: 8, 32>}]} {
    %c0 = arith.constant 0 : index
    %c0_0 = arith.constant 0 : index
    %0 = vector.load %arg1[%c0, %c0_0] : memref<64x32xbf16, #tpu.memory_space<vmem>>, vector<64x32xbf16>
    %c0_1 = arith.constant 0 : index
    %c0_2 = arith.constant 0 : index
    %1 = vector.load %arg4[%c0_1, %c0_2] : memref<32x4xbf16, #tpu.memory_space<vmem>>, vector<32x4xbf16>
    %cst = arith.constant dense<0.000000e+00> : vector<64x4xf32>
    %2 = tpu.matmul %0, %1, %cst {dimension_numbers = #tpu.dot_dimension_numbers<[1], [0], [0], [1], [0, 0, 1, 1], [], []>} : vector<64x32xbf16>, vector<32x4xbf16>, vector<64x4xf32> -> vector<64x4xf32>
    %c0_3 = arith.constant 0 : index
    %c0_4 = arith.constant 0 : index
    %3 = vector.load %arg2[%c0_3, %c0_4] : memref<64x32xbf16, #tpu.memory_space<vmem>>, vector<64x32xbf16>
    %c0_5 = arith.constant 0 : index
    %c0_6 = arith.constant 0 : index
    %4 = vector.load %arg5[%c0_5, %c0_6] : memref<32x32xbf16, #tpu.memory_space<vmem>>, vector<32x32xbf16>
    %cst_7 = arith.constant dense<0.000000e+00> : vector<64x32xf32>
    %5 = tpu.matmul %3, %4, %cst_7 {dimension_numbers = #tpu.dot_dimension_numbers<[1], [0], [0], [1], [0, 0, 1, 1], [], []>} : vector<64x32xbf16>, vector<32x32xbf16>, vector<64x32xf32> -> vector<64x32xf32>
    %c0_8 = arith.constant 0 : index
    %c0_9 = arith.constant 0 : index
    %c0_10 = arith.constant 0 : index
    %6 = vector.load %arg3[%c0_8, %c0_9, %c0_10] : memref<8x8x4xf32, #tpu.memory_space<vmem>>, vector<8x8x4xf32>
    %c0_11 = arith.constant 0 : index
    %c0_12 = arith.constant 0 : index
    %7 = vector.load %arg6[%c0_11, %c0_12] : memref<4x32xf32, #tpu.memory_space<vmem>>, vector<4x32xf32>
    %c0_13 = arith.constant 0 : index
    %c0_14 = arith.constant 0 : index
    %8 = vector.load %arg7[%c0_13, %c0_14] : memref<8x64xf32, #tpu.memory_space<vmem>>, vector<8x64xf32>
    %c0_15 = arith.constant 0 : index
    %c0_16 = arith.constant 0 : index
    %9 = vector.load %arg8[%c0_15, %c0_16] : memref<32x32xbf16, #tpu.memory_space<vmem>>, vector<32x32xbf16>
    %c0_17 = arith.constant 0 : index
    %c0_18 = arith.constant 0 : index
    %10 = vector.load %arg9[%c0_17, %c0_18] : memref<1x32xf32, #tpu.memory_space<vmem>>, vector<1x32xf32>
    %11 = vector.shape_cast %2 : vector<64x4xf32> to vector<8x8x4xf32>
    %12 = arith.addf %11, %6 : vector<8x8x4xf32>
    %cst_19 = arith.constant dense<0xFF800000> : vector<8x4xf32>
    %13 = vector.multi_reduction <maximumf>, %12, %cst_19 [1] : vector<8x8x4xf32> to vector<8x4xf32>
    %14 = vector.shape_cast %13 : vector<8x4xf32> to vector<8x1x4xf32>
    %15 = vector.broadcast %14 : vector<8x1x4xf32> to vector<8x8x4xf32>
    %16 = arith.subf %12, %15 : vector<8x8x4xf32>
    %17 = math.exp %16 : vector<8x8x4xf32>
    %cst_20 = arith.constant dense<0.000000e+00> : vector<8x4xf32>
    %18 = vector.multi_reduction <add>, %17, %cst_20 [1] : vector<8x8x4xf32> to vector<8x4xf32>
    %19 = vector.shape_cast %18 : vector<8x4xf32> to vector<8x1x4xf32>
    %20 = tpu.reciprocal %19 {approx = true} : vector<8x1x4xf32> -> vector<8x1x4xf32>
    %21 = arith.mulf %19, %20 : vector<8x1x4xf32>
    %cst_21 = arith.constant 2.000000e+00 : f32
    %22 = vector.broadcast %cst_21 : f32 to vector<8x1x4xf32>
    %23 = arith.subf %22, %21 : vector<8x1x4xf32>
    %24 = arith.mulf %20, %23 : vector<8x1x4xf32>
    %25 = vector.broadcast %24 : vector<8x1x4xf32> to vector<8x8x4xf32>
    %26 = arith.mulf %17, %25 : vector<8x8x4xf32>
    %27 = vector.shape_cast %26 : vector<8x8x4xf32> to vector<64x4xf32>
    %cst_22 = arith.constant dense<0.000000e+00> : vector<64x32xf32>
    %28 = tpu.matmul %27, %7, %cst_22 {dimension_numbers = #tpu.dot_dimension_numbers<[1], [0], [0], [1], [0, 0, 1, 1], [], []>} : vector<64x4xf32>, vector<4x32xf32>, vector<64x32xf32> -> vector<64x32xf32>
    %29 = arith.mulf %28, %5 : vector<64x32xf32>
    %cst_23 = arith.constant dense<0.000000e+00> : vector<8x32xf32>
    %30 = tpu.matmul %8, %29, %cst_23 {dimension_numbers = #tpu.dot_dimension_numbers<[1], [0], [0], [1], [0, 0, 1, 1], [], []>} : vector<8x64xf32>, vector<64x32xf32>, vector<8x32xf32> -> vector<8x32xf32>
    %31 = arith.truncf %30 : vector<8x32xf32> to vector<8x32xbf16>
    %cst_24 = arith.constant dense<0.000000e+00> : vector<8x32xf32>
    %32 = tpu.matmul %31, %9, %cst_24 {dimension_numbers = #tpu.dot_dimension_numbers<[1], [0], [0], [1], [0, 0, 1, 1], [], []>} : vector<8x32xbf16>, vector<32x32xbf16>, vector<8x32xf32> -> vector<8x32xf32>
    %33 = vector.broadcast %10 : vector<1x32xf32> to vector<8x32xf32>
    %34 = arith.addf %32, %33 : vector<8x32xf32>
    %c0_25 = arith.constant 0 : index
    %c0_26 = arith.constant 0 : index
    %35 = vector.load %arg10[%c0_25, %c0_26] : memref<8x32xf32, #tpu.memory_space<vmem>>, vector<8x32xf32>
    tpu.vector_store %arg10[%c0_25, %c0_26], %34 {strides = array<i32>} : memref<8x32xf32, #tpu.memory_space<vmem>>, vector<8x32xf32>,
    return
  }
  func.func @transform_0(%arg0: i32) -> (i32, i32) {
    %c0_i32 = arith.constant 0 : i32
    %c0_i32_0 = arith.constant 0 : i32
    return %arg0, %c0_i32 : i32, i32
  }
  func.func @transform_1(%arg0: i32) -> (i32, i32) {
    %c0_i32 = arith.constant 0 : i32
    %c0_i32_0 = arith.constant 0 : i32
    return %arg0, %c0_i32 : i32, i32
  }
  func.func @transform_2(%arg0: i32) -> (i32, i32, i32) {
    %c0_i32 = arith.constant 0 : i32
    %c0_i32_0 = arith.constant 0 : i32
    %c0_i32_1 = arith.constant 0 : i32
    return %arg0, %c0_i32, %c0_i32_0 : i32, i32, i32
  }
  func.func @transform_3(%arg0: i32) -> (i32, i32) {
    %c0_i32 = arith.constant 0 : i32
    %c0_i32_0 = arith.constant 0 : i32
    %c0_i32_1 = arith.constant 0 : i32
    return %c0_i32, %c0_i32_0 : i32, i32
  }
  func.func @transform_4(%arg0: i32) -> (i32, i32) {
    %c0_i32 = arith.constant 0 : i32
    %c0_i32_0 = arith.constant 0 : i32
    %c0_i32_1 = arith.constant 0 : i32
    return %c0_i32, %c0_i32_0 : i32, i32
  }
  func.func @transform_5(%arg0: i32) -> (i32, i32) {
    %c0_i32 = arith.constant 0 : i32
    %c0_i32_0 = arith.constant 0 : i32
    %c0_i32_1 = arith.constant 0 : i32
    return %c0_i32, %c0_i32_0 : i32, i32
  }
  func.func @transform_6(%arg0: i32) -> (i32, i32) {
    %c0_i32 = arith.constant 0 : i32
    %c0_i32_0 = arith.constant 0 : i32
    %c0_i32_1 = arith.constant 0 : i32
    return %c0_i32, %c0_i32_0 : i32, i32
  }
  func.func @transform_7(%arg0: i32) -> (i32, i32) {
    %c0_i32 = arith.constant 0 : i32
    %c0_i32_0 = arith.constant 0 : i32
    %c0_i32_1 = arith.constant 0 : i32
    return %c0_i32, %c0_i32_0 : i32, i32
  }
  func.func @transform_8(%arg0: i32) -> (i32, i32) {
    %c0_i32 = arith.constant 0 : i32
    %c0_i32_0 = arith.constant 0 : i32
    %c0_i32_1 = arith.constant 0 : i32
    return %c0_i32, %c0_i32_0 : i32, i32
  }
  func.func @transform_9(%arg0: i32) -> (i32, i32) {
    %c0_i32 = arith.constant 0 : i32
    %c0_i32_0 = arith.constant 0 : i32
    return %arg0, %c0_i32 : i32, i32
  }
}

</mosaic_0001>

<bundles_post_ra>
// kernel: tpu_custom_call.1
= control target key start
LH: loop header
LB: loop body
LE: loop exit
PB: predicated region body
PF: predicated region fallthrough
CT: control target
= control target key end

     0   :  { %14 = vsyncpa [#allocation3], 0  ;;  %s1787_s0 = inlined_call_operand.vmem [shape: bf16[128,32], index: 0, kind: input, shape index: {}]   ;;  %s1788_s1 = inlined_call_operand.vmem [shape: bf16[128,32], index: 1, kind: input, shape index: {}]   ;;  %s1789_s2 = inlined_call_operand.vmem [shape: f32[16,8,4], index: 2, kind: input, shape index: {}]   ;;  %s1790_s3 = inlined_call_operand.vmem [shape: bf16[32,4], index: 3, kind: input, shape index: {}]   ;;  %s1791_s4 = inlined_call_operand.vmem [shape: bf16[32,32], index: 4, kind: input, shape index: {}]   ;;  %s1792_s5 = inlined_call_operand.vmem [shape: f32[4,32], index: 5, kind: input, shape index: {}]   ;;  %s1793_s6 = inlined_call_operand.vmem [shape: f32[8,64], index: 6, kind: input, shape index: {}]   ;;  %s1794_s7 = inlined_call_operand.vmem [shape: bf16[32,32], index: 7, kind: input, shape index: {}]   ;;  %s1795_s8 = inlined_call_operand.vmem [shape: f32[1,32], index: 8, kind: input, shape index: {}]   ;;  %s1796_s9 = inlined_call_operand.hbm [shape: f32[16,32], index: 9, kind: output, shape index: {}]  }
   0x1   :  { %16 = vsyncpa [#allocation3 + $0x1], 0  ;;  %s1561_s30 = smov 0   ;;  %s1563_s10 = smov 0  }
   0x2   :  { %s1565_s11 = smov 0   ;;  %s1567_s12 = smov 0  }
   0x3 LB: > { %s1582_s13 = sadd.s32 4294967295, %s1505_s12   ;;  %s1196_s14 = sadd.s32 4294967294, %s1505_s12   ;;  %s1505_s12 = sphi %s1567_s12, %s1802_s12   ;;  %s1501_s11 = sphi %s1565_s11, %s1801_s11   ;;  %s1497_s10 = sphi %s1563_s10, %s1800_s10   ;;  %s1493_s30 = sphi %s1561_s30, %s1799_s30  }
   0x4   : > { %s1586_s15 = sadd.s32 1, %s1505_s12   ;;  %s233_s16 = sadd.s32 1, %s1501_s11 }
   0x5   : > { %s230_s17 = ssub.s32 %s1505_s12, %s1586_s15  ;;  %p243_p0 = scmp.ne.s32.totalorder %s1501_s11, %s1497_s10 }
   0x6   : > { %p231_p1 = scmp.eq.s32.totalorder %s230_s17, 0  ;;  %p244_p2 = scmp.eq.s32.totalorder %s1582_s13, 1 }
   0x7   : > { %p249_p3 = scmp.ne.s32.totalorder %s1497_s10, %s1493_s30  ;;  %p250_p4 = scmp.eq.s32.totalorder %s1196_s14, 1 }
   0x8   : > { %s1597_s18 = scalar_select %p231_p1, %s1501_s11, %s233_s16  }
   0x9   : > { %p1599_p5 = por %p244_p2, %p243_p0  ;;  %p1603_p6 = por %p250_p4, %p249_p3 }
   0xa   : > { %p1199_p7 = scmp.ge.s32.totalorder %s1505_s12, 1  ;;  %p313_p8 = scmp.lt.s32.totalorder %s1505_s12, 3 }
   0xc   : > { %p314_p9 = pnand %p1199_p7, %p313_p8 }
   0xd   : > { %v1397_v0 = vld [vmem:[%s1790_s3] sm:$0xff] (!%p314_p9)   ;;  %s1201_s23 = sshll.u32 (!%p314_p9), %s1582_s13, 3  ;;  %v1398_v1 = vld [vmem:[%s1790_s3 + $0x8] sm:$0xff] (!%p314_p9)   ;;  %vm422_vm0 = vcmask (!%p314_p9), 261120   ;;  %vm845_vm1 = vcmask (!%p314_p9), 1043456   ;;  %vm644_vm2 = vcmask (!%p314_p9), 31744  }
   0xe   : > { %317 = sbr.rel (%p314_p9) target bundleno = 981 (0x3d5), region = 56  ;;  %p360_p10 = scmp.lt.s32.totalorder (!%p314_p9), %s1201_s23, 15  ;;  %1278 = vmatprep.subr.bf16.mxu0 (!%p314_p9), %v1397_v0  ;;  %v1403_v6 = vld [vmem:[%s1791_s4] sm:$0xff] (!%p314_p9)   ;;  %v1404_v7 = vld [vmem:[%s1791_s4 + $0x8] sm:$0xff] (!%p314_p9)   ;;  %vm1508_vm3 = vmmov (!%p314_p9), 0   ;;  %vm962_vm4 = vcmask (!%p314_p9), 523264  }
   0xf   : > { %1279 = vmatpush3.bf16.msra.mxu0 (!%p314_p9), %v1397_v0  ;;  %1290 = vmatprep.subr.bf16.mxu1 (!%p314_p9), %v1403_v6  ;;  %v629_v10 = vld [vmem:[%s1792_s5] sm:$0xf] (!%p314_p9)  ;;  %s356_s27 = sand.u32 (!%p314_p9), 1, %s1497_s10   ;;  %s1242_s14 = sshll.u32 (!%p314_p9), %s1582_s13, 7 }
  0x10   : > { %1280 = vmatprep.subr.bf16.mxu0 (!%p314_p9), %v1398_v1  ;;  %1291 = vmatpush3.bf16.msra.mxu1 (!%p314_p9), %v1403_v6  ;;  %s1200_s28 = sshll.u32 (!%p314_p9), %s356_s27, 3  ;;  %s1744_s22 = scalar_lea.hbm (!%p314_p9), %s1796_s9, %s1242_s14 }
  0x11   : > { %1292 = vmatprep.subr.bf16.mxu1 (!%p314_p9), %v1404_v7  ;;  %s1100_s13 = scalar_lea.sflag (!%p314_p9), [#allocation3], %s356_s27 }
  0x13   : > { %1281 = vmatpush3.bf16.msra.mxu0 (!%p314_p9), %v1398_v1 }
  0x14   : > { %1293 = vmatpush3.bf16.msra.mxu1 (!%p314_p9), %v1404_v7  ;;  %1302 = vmatprep.subr.msk.mxu0 (!%p314_p9), %vm845_vm1, %v629_v10 }
  0x15   : > { %s1804_s23 = smov (!%p360_p10, %s1201_s23), 15 }
  0x16   : > { %s1202_s26 = sshll.u32 %s1804_s23, 2 }
  0x17   : > { %s363_s29 = scalar_lea.vmem %s1787_s0, %s1202_s26  ;;  %s369_s25 = scalar_lea.vmem %s1788_s1, %s1202_s26 }
  0x18   : > { %v1399_v2 = vld [vmem:[%s363_s29] sm:$0xff]   ;;  %v1400_v3 = vld [vmem:[%s363_s29 + $0x8] sm:$0xff]   ;;  %v1401_v4 = vld [vmem:[%s363_s29 + $0x10] sm:$0xff]   ;;  %s1206_s26 = sshll.u32 %s1804_s23, 3 }
  0x19   : > { %1282 = vmatprep.mubr.msk.bf16.mxu0 %vm422_vm0, %v1399_v2  ;;  %v1402_v5 = vld [vmem:[%s363_s29 + $0x18] sm:$0xff]   ;;  %v1405_v8 = vld [vmem:[%s369_s25] sm:$0xff]   ;;  %v1406_v9 = vld [vmem:[%s369_s25 + $0x8] sm:$0xff]   ;;  %s1646_s16 = scalar_lea.vmem %s1789_s2, %s1206_s26 }
  0x1a   : > { %1283 = vmatmul.mubr.msk.bf16.vlgmr.msra.gmra.mrb[0].mxu0 %vm422_vm0, %v1400_v3  ;;  %1294 = vmatprep.mubr.msk.bf16.mxu1 %vm422_vm0, %v1405_v8  ;;  %v1407_v11 = vld [vmem:[%s369_s25 + $0x10] sm:$0xff]   ;;  %v1408_v12 = vld [vmem:[%s369_s25 + $0x18] sm:$0xff]   ;;  %v621_v14 = vld [vmem:[%s1646_s16] sm:$0xff]  ;;  %s1510_s25 = smov [#allocation2]  }
  0x1b   : > { %1286 = vmatprep.mubr.msk.bf16.mxu0 %vm422_vm0, %v1401_v4  ;;  %1295 = vmatmul.mubr.msk.bf16.vlgmr.msra.gmra.mrb[0].mxu1 %vm422_vm0, %v1406_v9  ;;  %v623_v13 = vld [vmem:[%s1646_s16 + $0x10] sm:$0xff]  ;;  %v624_v16 = vld [vmem:[%s1646_s16 + $0x18] sm:$0xff]  ;;  %v622_v19 = vld [vmem:[%s1646_s16 + $0x8] sm:$0xff] }
  0x1c   : > { %1303 = vmatpush3.msk.msra.mxu0 %vm845_vm1, %v629_v10  ;;  %1298 = vmatprep.mubr.msk.bf16.mxu1 %vm422_vm0, %v1407_v11  ;;  %v627_v33 = vld [vmem:[%s1646_s16 + $0x30] sm:$0xff]  ;;  %v625_v36 = vld [vmem:[%s1646_s16 + $0x20] sm:$0xff]  ;;  %v628_v40 = vld [vmem:[%s1646_s16 + $0x38] sm:$0xff] }
  0x1d   : > { %v626_v58 = vld [vmem:[%s1646_s16 + $0x28] sm:$0xff]  ;;  %s358_s16 = scalar_lea.vmem [#allocation2], %s1200_s28  ;;  %s1447_s28 = sshll.u32 %s1510_s25, 4  ;;  %s1448_s28 = int_to_ptr.vmem [resolvable:$false] %s1447_s28 }
  0x1e   : > { %s1113_s23 = sshll.u32 %s358_s16, 4  ;;  %s1449_s26 = scalar_lea.vmem %s1448_s28, 256  ;;  %s1746_s23 = int_to_ptr.vmem [resolvable:$true] %s1113_s23 }
  0x1f   : > { %s1443_s24 = scalar_lea.vmem %s1746_s23, 128  ;;  %p1450_p0 = scmp.lt.s32.totalorder %s1746_s23, %s1448_s28 }
  0x20   : > { %p1444_p11 = scmp.ne.s32.totalorder %s1746_s23, %s1443_s24  ;;  %p1451_p1 = scmp.lt.s32.totalorder %s1449_s26, %s1443_s24 }
  0x22   : > { %1287 = vmatmul.mubr.msk.bf16.gmra.mrb[4].mxu0 %vm422_vm0, %v1402_v5  ;;  %p1445_p12 = pnand %p1444_p11, %p1599_p5  ;;  %p1452_p2 = por %p1451_p1, %p1450_p0 }
  0x23   : > { %1299 = vmatmul.mubr.msk.bf16.gmra.mrb[4].mxu1 %vm422_vm0, %v1408_v12 }
  0x24   : > { %p1446_p13 = pneg %p1445_p12 }
  0x26   : > { %p1453_p3 = pnand %p1452_p2, %p1446_p13 }
  0xed   : > { %v1284_v15 = vpop.f32.mrb[0].mxu0 }
  0xee   : > { %v638_v17 = vadd.f32 %v1284_v15, %v623_v13  ;;  %v469_v18 = vpop.f32.mrb[1].mxu0 }
  0xef   : > { %v1652_v20 = vadd.f32 %v621_v14, %v469_v18  ;;  %v1285_v21 = vpop.f32.mrb[2].mxu0 }
  0xf0   : > { %v659_v22 = vsel %vm644_vm2, %v638_v17, -inf  ;;  %v1655_v23 = vadd.f32 %v1285_v21, %v624_v16  ;;  %v472_v24 = vpop.f32.mrb[3].mxu0 }
  0xf1   : > { %v660_v25 = vrot.slane %v659_v22, 4  ;;  %v645_v26 = vsel %vm644_vm2, %v1652_v20, -inf  ;;  %v1659_v27 = vadd.f32 %v622_v19, %v472_v24 }
  0xf2   : > { %v646_v28 = vrot.slane %v645_v26, 4  ;;  %v666_v29 = vsel %vm644_vm2, %v1655_v23, -inf }
  0xf3   : > { %v661_v30 = vmax.f32 %v659_v22, %v660_v25  ;;  %v667_v31 = vrot.slane %v666_v29, 4  ;;  %v652_v32 = vsel %vm644_vm2, %v1659_v27, -inf }
  0xf4   : > { %v647_v34 = vmax.f32 %v645_v26, %v646_v28  ;;  %v653_v35 = vrot.slane %v652_v32, 4 }
  0xf5   : > { %v662_v37 = vrot.slane %v661_v30, 2  ;;  %v668_v38 = vmax.f32 %v666_v29, %v667_v31  ;;  %v1288_v39 = vpop.f32.mrb[4].mxu0 }
  0xf6   : > { %v648_v41 = vrot.slane %v647_v34, 2  ;;  %v654_v42 = vmax.f32 %v652_v32, %v653_v35  ;;  %v642_v43 = vadd.f32 %v1288_v39, %v627_v33  ;;  %v485_v44 = vpop.f32.mrb[5].mxu0 }
  0xf7   : > { %v663_v45 = vmax.f32 %v661_v30, %v662_v37  ;;  %v669_v46 = vrot.slane %v668_v38, 2  ;;  %v640_v47 = vadd.f32 %v625_v36, %v485_v44  ;;  %v1289_v48 = vpop.f32.mrb[6].mxu0 }
  0xf8   : > { %v649_v49 = vmax.f32 %v647_v34, %v648_v41  ;;  %v655_v50 = vrot.slane %v654_v42, 2  ;;  %v687_v51 = vsel %vm644_vm2, %v642_v43, -inf  ;;  %v643_v52 = vadd.f32 %v1289_v48, %v628_v40  ;;  %v488_v53 = vpop.f32.mrb[7].mxu0 }
  0xf9   : > { %v664_v54 = vrot.slane %v663_v45, 1  ;;  %v670_v55 = vmax.f32 %v668_v38, %v669_v46  ;;  %v688_v56 = vrot.slane %v687_v51, 4  ;;  %v673_v57 = vsel %vm644_vm2, %v640_v47, -inf }
  0xfa   : > { %v650_v59 = vrot.slane %v649_v49, 1  ;;  %v656_v60 = vmax.f32 %v654_v42, %v655_v50  ;;  %v674_v61 = vrot.slane %v673_v57, 4  ;;  %v694_v62 = vsel %vm644_vm2, %v643_v52, -inf }
  0xfb   : > { %v665_v63 = vmax.f32 %v663_v45, %v664_v54  ;;  %v671_v0 = vrot.slane %v670_v55, 1  ;;  %v689_v1 = vmax.f32 %v687_v51, %v688_v56  ;;  %v695_v2 = vrot.slane %v694_v62, 4 }
  0xfc   : > { %v651_v3 = vmax.f32 %v649_v49, %v650_v59  ;;  %v657_v4 = vrot.slane %v656_v60, 1  ;;  %v675_v5 = vmax.f32 %v673_v57, %v674_v61  ;;  %v641_v6 = vadd.f32 %v626_v58, %v488_v53 }
  0xfd   : > { %v703_v7 = vsub.f32 %v638_v17, %v665_v63  ;;  %v672_v8 = vmax.f32 %v670_v55, %v671_v0  ;;  %v690_v9 = vrot.slane %v689_v1, 2  ;;  %v696_v10 = vmax.f32 %v694_v62, %v695_v2 }
  0xfe   : > { %v701_v11 = vsub.f32 %v1652_v20, %v651_v3  ;;  %v658_v12 = vmax.f32 %v656_v60, %v657_v4  ;;  %v676_v13 = vrot.slane %v675_v5, 2  ;;  %v680_v14 = vsel %vm644_vm2, %v641_v6, -inf }
  0xff   : > { %v713_v15 = vmul.f32 1.442695, %v703_v7  ;;  %v704_v16 = vsub.f32 %v1655_v23, %v672_v8  ;;  %v691_v18 = vmax.f32 %v689_v1, %v690_v9  ;;  %v697_v19 = vrot.slane %v696_v10, 2 }
 0x100   : > { %v709_v21 = vmul.f32 1.442695, %v701_v11  ;;  %v702_v22 = vsub.f32 %v1659_v27, %v658_v12  ;;  %v677_v24 = vmax.f32 %v675_v5, %v676_v13  ;;  %v681_v25 = vrot.slane %v680_v14, 4 }
 0x101   : > { %1411 = vpow2.f32 %v713_v15  ;;  %v715_v17 = vmul.f32 1.442695, %v704_v16  ;;  %v692_v26 = vrot.slane %v691_v18, 1  ;;  %v698_v28 = vmax.f32 %v696_v10, %v697_v19 }
 0x102   : > { %1413 = vpow2.f32 %v709_v21  ;;  %v711_v20 = vmul.f32 1.442695, %v702_v22  ;;  %v678_v29 = vrot.slane %v677_v24, 1  ;;  %v682_v30 = vmax.f32 %v680_v14, %v681_v25 }
 0x103   : > { %1415 = vpow2.f32 %v715_v17  ;;  %v693_v31 = vmax.f32 %v691_v18, %v692_v26  ;;  %v699_v32 = vrot.slane %v698_v28, 1 }
 0x104   : > { %1417 = vpow2.f32 %v711_v20  ;;  %v679_v23 = vmax.f32 %v677_v24, %v678_v29  ;;  %v683_v33 = vrot.slane %v682_v30, 2 }
 0x105   : > { %v707_v34 = vsub.f32 %v642_v43, %v693_v31  ;;  %v700_v35 = vmax.f32 %v698_v28, %v699_v32 }
 0x106   : > { %v705_v36 = vsub.f32 %v640_v47, %v679_v23  ;;  %v684_v27 = vmax.f32 %v682_v30, %v683_v33 }
 0x107   : > { %v721_v37 = vmul.f32 1.442695, %v707_v34  ;;  %v708_v38 = vsub.f32 %v643_v52, %v700_v35 }
 0x108   : > { %v717_v39 = vmul.f32 1.442695, %v705_v36  ;;  %v685_v40 = vrot.slane %v684_v27, 1 }
 0x109   : > { %1419 = vpow2.f32 %v721_v37  ;;  %v723_v41 = vmul.f32 1.442695, %v708_v38 }
 0x10a   : > { %1421 = vpow2.f32 %v717_v39  ;;  %v686_v42 = vmax.f32 %v684_v27, %v685_v40 }
 0x10b   : > { %v1676_v44 = vpop.eup %1411  ;;  %1423 = vpow2.f32 %v723_v41 }
 0x10c   : > { %v1678_v45 = vpop.eup %1413  ;;  %v739_v46 = vsel %vm644_vm2, %v1676_v44, 0.0  ;;  %v706_v43 = vsub.f32 %v641_v6, %v686_v42 }
 0x10d   : > { %v1682_v48 = vpop.eup %1415  ;;  %v740_v47 = vrot.slane %v739_v46, 4  ;;  %v725_v49 = vsel %vm644_vm2, %v1678_v45, 0.0 }
 0x10e   : > { %v1686_v50 = vpop.eup %1417  ;;  %v726_v51 = vrot.slane %v725_v49, 4  ;;  %v746_v52 = vsel %vm644_vm2, %v1682_v48, 0.0  ;;  %v719_v53 = vmul.f32 1.442695, %v706_v43 }
 0x10f   : > { %v741_v54 = vadd.f32 %v740_v47, %v739_v46  ;;  %v747_v55 = vrot.slane %v746_v52, 4  ;;  %v732_v56 = vsel %vm644_vm2, %v1686_v50, 0.0 }
 0x110   : > { %v727_v57 = vadd.f32 %v726_v51, %v725_v49  ;;  %v733_v58 = vrot.slane %v732_v56, 4  ;;  %1425 = vpow2.f32 %v719_v53 }
 0x111   : > { %v742_v59 = vrot.slane %v741_v54, 2  ;;  %v748_v60 = vadd.f32 %v747_v55, %v746_v52 }
 0x112   : > { %v728_v61 = vrot.slane %v727_v57, 2  ;;  %v734_v62 = vadd.f32 %v733_v58, %v732_v56 }
 0x113   : > { %v1692_v63 = vpop.eup %1419  ;;  %v749_v0 = vrot.slane %v748_v60, 2  ;;  %v743_v1 = vadd.f32 %v742_v59, %v741_v54 }
 0x114   : > { %v1694_v2 = vpop.eup %1421  ;;  %v735_v3 = vrot.slane %v734_v62, 2  ;;  %v767_v4 = vsel %vm644_vm2, %v1692_v63, 0.0  ;;  %v729_v5 = vadd.f32 %v728_v61, %v727_v57 }
 0x115   : > { %v1698_v6 = vpop.eup %1423  ;;  %v768_v7 = vrot.slane %v767_v4, 4  ;;  %v753_v8 = vsel %vm644_vm2, %v1694_v2, 0.0  ;;  %v744_v9 = vrot.slane %v743_v1, 1  ;;  %v750_v10 = vadd.f32 %v749_v0, %v748_v60 }
 0x116   : > { %v736_v11 = vadd.f32 %v735_v3, %v734_v62  ;;  %v754_v12 = vrot.slane %v753_v8, 4  ;;  %v774_v13 = vsel %vm644_vm2, %v1698_v6, 0.0  ;;  %v730_v14 = vrot.slane %v729_v5, 1 }
 0x117   : > { %v769_v15 = vadd.f32 %v768_v7, %v767_v4  ;;  %v775_v16 = vrot.slane %v774_v13, 4  ;;  %v745_v18 = vadd.f32 %v744_v9, %v743_v1  ;;  %v751_v19 = vrot.slane %v750_v10, 1 }
 0x118   : > { %v737_v21 = vrot.slane %v736_v11, 1  ;;  %v755_v22 = vadd.f32 %v754_v12, %v753_v8  ;;  %v731_v24 = vadd.f32 %v730_v14, %v729_v5 }
 0x119   : > { %v770_v25 = vrot.slane %v769_v15, 2  ;;  %v776_v17 = vadd.f32 %v775_v16, %v774_v13  ;;  %1427 = vrcp.f32 %v745_v18  ;;  %v752_v26 = vadd.f32 %v751_v19, %v750_v10 }
 0x11a   : > { %v1704_v28 = vpop.eup %1425  ;;  %v738_v20 = vadd.f32 %v737_v21, %v736_v11  ;;  %v756_v29 = vrot.slane %v755_v22, 2  ;;  %1429 = vrcp.f32 %v731_v24 }
 0x11b   : > { %v777_v30 = vrot.slane %v776_v17, 2  ;;  %v760_v31 = vsel %vm644_vm2, %v1704_v28, 0.0  ;;  %1431 = vrcp.f32 %v752_v26  ;;  %v771_v32 = vadd.f32 %v770_v25, %v769_v15 }
 0x11c   : > { %1433 = vrcp.f32 %v738_v20  ;;  %v761_v23 = vrot.slane %v760_v31, 4  ;;  %v757_v33 = vadd.f32 %v756_v29, %v755_v22 }
 0x11d   : > { %v772_v34 = vrot.slane %v771_v32, 1  ;;  %v778_v35 = vadd.f32 %v777_v30, %v776_v17 }
 0x11e   : > { %v762_v36 = vadd.f32 %v761_v23, %v760_v31  ;;  %v758_v27 = vrot.slane %v757_v33, 1  ;;  %v1507_v23 = vmov 0.0|0.0  }
 0x11f   : > { %v773_v37 = vadd.f32 %v772_v34, %v771_v32  ;;  %v779_v38 = vrot.slane %v778_v35, 1  ;;  %1343 = vmatprep.subr.bf16.mxu1 %v1507_v23 }
 0x120   : > { %v763_v39 = vrot.slane %v762_v36, 2  ;;  %v759_v40 = vadd.f32 %v758_v27, %v757_v33 }
 0x121   : > { %1435 = vrcp.f32 %v773_v37  ;;  %v780_v41 = vadd.f32 %v779_v38, %v778_v35 }
 0x122   : > { %1437 = vrcp.f32 %v759_v40  ;;  %v764_v42 = vadd.f32 %v763_v39, %v762_v36 }
 0x123   : > { %v1428_v46 = vpop.eup %1427  ;;  %1439 = vrcp.f32 %v780_v41 }
 0x124   : > { %v1430_v43 = vpop.eup %1429  ;;  %v791_v47 = vmul.f32 %v1428_v46, %v745_v18  ;;  %v765_v49 = vrot.slane %v764_v42, 1 }
 0x125   : > { %v1432_v51 = vpop.eup %1431  ;;  %v789_v52 = vmul.f32 %v1430_v43, %v731_v24 }
 0x126   : > { %v1434_v53 = vpop.eup %1433  ;;  %v799_v54 = vsub.f32 2.0, %v791_v47  ;;  %v792_v55 = vmul.f32 %v1432_v51, %v752_v26  ;;  %v766_v56 = vadd.f32 %v765_v49, %v764_v42 }
 0x127   : > { %v790_v57 = vmul.f32 %v1434_v53, %v738_v20  ;;  %v797_v58 = vsub.f32 2.0, %v789_v52 }
 0x128   : > { %1441 = vrcp.f32 %v766_v56  ;;  %v800_v61 = vsub.f32 2.0, %v792_v55  ;;  %v807_v62 = vmul.f32 %v1428_v46, %v799_v54  ;;  %v630_v55 = vld [vmem:[%s1793_s6] sm:$0xff] }
 0x129   : > { %v798_v59 = vsub.f32 2.0, %v790_v57  ;;  %v805_v60 = vmul.f32 %v1430_v43, %v797_v58  ;;  %v1410_v57 = vld [vmem:[%s1794_s7 + $0x8] sm:$0xff]  }
 0x12a   : > { %v808_v7 = vmul.f32 %v1432_v51, %v800_v61  ;;  %v815_v10 = vmul.f32 %v1676_v44, %v807_v62  ;;  %v1237_v61 = vld [vmem:[%s1795_s8] ss:$0 sm:$0xff] }
 0x12b   : > { %v1436_v0 = vpop.eup %1435  ;;  %v806_v1 = vmul.f32 %v1434_v53, %v798_v59  ;;  %v813_v3 = vmul.f32 %v1678_v45, %v805_v60 }
 0x12c   : > { %v1438_v4 = vpop.eup %1437  ;;  %v795_v11 = vmul.f32 %v1436_v0, %v773_v37  ;;  %v816_v13 = vmul.f32 %v1682_v48, %v808_v7 }
 0x12d   : > { %v814_v5 = vmul.f32 %v1686_v50, %v806_v1  ;;  %1304 = vmatprep.mubr.msk.f32.mxu0 %vm644_vm2, %v813_v3  ;;  %v793_v8 = vmul.f32 %v1438_v4, %v759_v40  ;;  %v1440_v9 = vpop.eup %1439 }
 0x12e   : > { %v796_v45 = vmul.f32 %v1440_v9, %v780_v41  ;;  %v803_v16 = vsub.f32 2.0, %v795_v11 }
 0x12f   : > { %1305 = vmatmul.mubr.msk.f32.vlgmr.msra.gmra.mrb[8].mxu0 %vm644_vm2, %v814_v5  ;;  %v801_v12 = vsub.f32 2.0, %v793_v8 }
 0x130   : > { %1307 = vmatprep.mubr.msk.f32.mxu0 %vm644_vm2, %v815_v10  ;;  %v804_v19 = vsub.f32 2.0, %v796_v45  ;;  %v811_v21 = vmul.f32 %v1436_v0, %v803_v16 }
 0x131   : > { %v809_v14 = vmul.f32 %v1438_v4, %v801_v12 }
 0x132   : > { %v1442_v15 = vpop.eup %1441  ;;  %v812_v25 = vmul.f32 %v1440_v9, %v804_v19  ;;  %v819_v48 = vmul.f32 %v1692_v63, %v811_v21  ;;  %v1509_v63 = vmov 0.0  }
 0x133   : > { %1308 = vmatmul.mubr.msk.f32.gmra.mrb[10].mxu0 %vm644_vm2, %v816_v13  ;;  %v817_v50 = vmul.f32 %v1694_v2, %v809_v14  ;;  %v794_v18 = vmul.f32 %v1442_v15, %v766_v56  ;;  %v1296_v2 = vpop.f32.mrb[0].mxu1  ;;  %1332 = vmatprep.mubr.msk.f32.mxu1 %vm1508_vm3, %v1509_v63  ;;  %v1409_v56 = vld [vmem:[%s1794_s7] sm:$0xff]  }
 0x134   : > { %v820_v17 = vmul.f32 %v1698_v6, %v812_v25  ;;  %v590_v26 = vpop.f32.mrb[1].mxu1 }
 0x135   : > { %1310 = vmatprep.mubr.msk.f32.mxu0 %vm644_vm2, %v817_v50  ;;  %v802_v44 = vsub.f32 2.0, %v794_v18  ;;  %v1297_v20 = vpop.f32.mrb[2].mxu1 }
 0x136   : > { %v593_v29 = vpop.f32.mrb[3].mxu1 }
 0x137   : > { %v810_v22 = vmul.f32 %v1442_v15, %v802_v44  ;;  %v1300_v30 = vpop.f32.mrb[4].mxu1 }
 0x138   : > { %v606_v31 = vpop.f32.mrb[5].mxu1 }
 0x139   : > { %v818_v24 = vmul.f32 %v1704_v28, %v810_v22  ;;  %v1301_v32 = vpop.f32.mrb[6].mxu1 }
 0x13a   : > { %v609_v28 = vpop.f32.mrb[7].mxu1 }
 0x13b   : > { %1311 = vmatmul.mubr.msk.f32.gmra.mrb[12].mxu0 %vm644_vm2, %v818_v24 }
 0x13c   : > { %1313 = vmatprep.mubr.msk.f32.mxu0 %vm644_vm2, %v819_v48 }
 0x13f   : > { %1314 = vmatmul.mubr.msk.f32.gmra.mrb[14].mxu0 %vm644_vm2, %v820_v17 }
 0x202   : > { %v1306_v33 = vpop.f32.mrb[8].mxu0 }
 0x203   : > { %v955_v34 = vmul.f32 %v1306_v33, %v593_v29  ;;  %v915_v35 = vpop.f32.mrb[9].mxu0 }
 0x204   : > { %v954_v6 = vmul.f32 %v915_v35, %v590_v26 }
 0x206   : > { %v1344_v36 = vpack.c.bf16 %v955_v34, %v954_v6  ;;  %v1309_v27 = vpop.f32.mrb[10].mxu0 }
 0x207   : > { %v957_v37 = vmul.f32 %v1309_v27, %v1297_v20  ;;  %v925_v38 = vpop.f32.mrb[11].mxu0 }
 0x208   : > { %v956_v39 = vmul.f32 %v1296_v2, %v925_v38  ;;  %1345 = vmatpush3.bf16.msra.mxu1 %v1344_v36 }
 0x209   : > { %1346 = vmatprep.subr.bf16.mxu1 %v1507_v23 }
 0x20a   : > { %v1347_v40 = vpack.c.bf16 %v957_v37, %v956_v39 }
 0x20c   : > { %1348 = vmatpush3.bf16.msra.mxu1 %v1347_v40 }
 0x20d   : > { %1349 = vmatprep.subr.bf16.mxu1 %v1507_v23 }
 0x20e   : > { %v1312_v41 = vpop.f32.mrb[12].mxu0 }
 0x20f   : > { %v959_v42 = vmul.f32 %v1312_v41, %v609_v28  ;;  %v935_v46 = vpop.f32.mrb[13].mxu0 }
 0x210   : > { %v958_v43 = vmul.f32 %v935_v46, %v606_v31 }
 0x212   : > { %v1350_v47 = vpack.c.bf16 %v959_v42, %v958_v43  ;;  %v1315_v49 = vpop.f32.mrb[14].mxu0 }
 0x213   : > { %v961_v51 = vmul.f32 %v1315_v49, %v1301_v32  ;;  %v945_v52 = vpop.f32.mrb[15].mxu0 }
 0x214   : > { %v960_v53 = vmul.f32 %v1300_v30, %v945_v52  ;;  %1351 = vmatpush3.bf16.msra.mxu1 %v1350_v47 }
 0x215   : > { %1352 = vmatprep.subr.bf16.mxu1 %v1507_v23 }
 0x216   : > { %v1353_v54 = vpack.c.bf16 %v961_v51, %v960_v53 }
 0x218   : > { %1354 = vmatpush3.bf16.msra.mxu1 %v1353_v54 }
 0x219   : > { %1335 = vmatprep.subr.bf16.mxu1 %v1509_v63 }
 0x21b   : > { %1333 = vmatmul.mubr.msk.f32.vlgmr.msra.gmra.mrb[8].mxu1 %vm962_vm4, %v630_v55 }
 0x21c   : > { %1336 = vmatpush3.bf16.msra.mxu1 %v1409_v56  ;;  %1339 = vmatprep.mubr.msk.bf16.mxu1 %vm1508_vm3, %v1509_v63 }
 0x21d   : > { %1337 = vmatprep.subr.bf16.mxu1 %v1509_v63 }
 0x220   : > { %1338 = vmatpush3.bf16.msra.mxu1 %v1410_v57 }
 0x2ee   : > { %v1032_v58 = vpop.f32.mrb[8].mxu1 }
 0x2ef   : > { %v1036_v59 = vpack.c.bf16 %v1032_v58, %v1032_v58  ;;  %v1334_v60 = vpop.f32.mrb[9].mxu1 }
 0x2f1   : > { %1340 = vmatmul.mubr.msk.bf16.vlgmr.msra.gmra.mrb[12].mxu1 %vm422_vm0, %v1036_v59 }
 0x3c4   : > { %v1092_v62 = vpop.f32.mrb[12].mxu1 }
 0x3c5   : > { %v1093_v0 = vadd.f32 %v1237_v61, %v1092_v62  ;;  %v1341_v1 = vpop.f32.mrb[13].mxu1 }
 0x3c6   : > { %v1095_v3 = vpop.f32.mrb[14].mxu1 }
 0x3c7   : > { %v1342_v4 = vpop.f32.mrb[15].mxu1  ;;  %1098 = vst.msk [vmem:[%s358_s16] sm:$0xff] %vm422_vm0, %v1093_v0 }
 0x3c8   : > { %1456 = shalt.err (!%p1453_p3)
}
 0x3c9   : > { %s1457_s27 = scalar_lea.hbm %s1744_s22, 128  ;;  %s1461_s16 = scalar_lea.hbm %s1796_s9, 256 }
 0x3ca   : > { %p1458_p4 = scmp.ne.s32.totalorder %s1744_s22, %s1457_s27  ;;  %p1462_p9 = scmp.lt.u32.totalorder %s1744_s22, %s1796_s9 }
 0x3cb   : > { %p1463_p10 = scmp.lt.u32.totalorder %s1461_s16, %s1457_s27  ;;  %p1465_p12 = scmp.lt.u32.totalorder %s1457_s27, %s1744_s22 }
 0x3cc   : > { %p1459_p7 = pnand %p1458_p4, %p1599_p5 }
 0x3cd   : > { %p1464_p11 = por %p1463_p10, %p1462_p9 }
 0x3ce   : > { %p1460_p8 = pneg %p1459_p7 }
 0x3cf   : > { %p1466_p13 = por %p1465_p12, %p1464_p11 }
 0x3d1   : > { %p1467_p0 = pnand %p1466_p13, %p1460_p8 }
 0x3d3   : > { %1470 = shalt.err (!%p1467_p0)
}
 0x3d4   : > { %1355 = dma.vmem_to_hbm [thread:$0]  (%p1599_p5), %s1746_s23, 128, %s1744_s22, %s1100_s13  }
 0x3d5 PF: > { %p1361_p1 = scmp.ge.s32.totalorder %s1505_s12, 2  ;;  %s1125_s24 = sand.u32 1, %s1493_s30  }
 0x3d6   : > { %s1126_s25 = scalar_lea.sflag [#allocation3], %s1125_s24 }
 0x3d7   : > { %p1358_p2 = pnand %p1361_p1, %p1603_p6 }
 0x3d9   : > { %1488 = dma.done.wait (!%p1358_p2), %s1126_s25, 128  }
 0x3da   : > { %1490 = vsyncadd (!%p1358_p2), %s1126_s25, 4294967168  ;;  %p19_p3 = scmp.ge.s32.totalorder %s1586_s15, 4   ;;  %s1799_s30 = smov %s1497_s10 }
 0x3db   : > { %s1800_s10 = smov %s1501_s11  ;;  %s1801_s11 = smov %s1597_s18 }
 0x3dc   : > { %s1802_s12 = smov %s1586_s15  ;;  %21 = sbr.rel (!%p19_p3) target bundleno = 3 (0x3), region = 97 }
 0x3e3   :  { %1131 = vsyncpa [#allocation3], 1 }
 0x3e4   :  { %1133 = vsyncpa [#allocation3 + $0x1], 1 }

</bundles_post_ra>
